<compile_context>
chip_gen: v7x
topology: tpu7x:2x2x1
jax: 0.10.0
libtpu: 0.0.40
codegen_flags: <defaults>
</compile_context>

<pallas_src>
import functools

import jax
import jax.numpy as jnp
from jax import lax
from jax.experimental import pallas as pl
from jax.experimental.pallas import tpu as pltpu

LARGE_NUMBER = 10000.0      # Always() initial rnn state
NEG_LARGE = -1000000.0      # RHS fill value for j > i (torch: ones * -1000000)


def _until_kernel(t1_ref, t2_ref, o_ref, r_ref, *, scale):
    """One lane-tile of the Until robustness trace.

    t1_ref, t2_ref, o_ref: [T, L]  (time on sublanes, (batch*x_dim) on lanes)
    r_ref: [T, L] f32 scratch holding R[i, j] = min(1e4, min_{s=j..i} trace1[s])
           (row index j), updated recurrently over the output time index i.
    """
    T = t1_ref.shape[0]

    # Hoisted out of the time loop.
    v = t2_ref[...].astype(jnp.float32)                          # trace2[j]  [T, L]
    j_idx = lax.broadcasted_iota(jnp.int32, v.shape, 0)          # row (j) index
    r_ref[...] = jnp.full(r_ref.shape, LARGE_NUMBER, dtype=r_ref.dtype)

    @pl.loop(0, T)
    def _(i):
        # Window-min recurrence over i:
        #   R_i[j] = min(R_{i-1}[j], trace1[i])  for j < i
        #   R_i[i] = min(LARGE_NUMBER, trace1[i])
        # (rows j > i hold garbage and are masked to NEG_LARGE below)
        u_i = t1_ref[pl.ds(i, 1), :].astype(jnp.float32)         # [1, L]
        r_new = jnp.minimum(jnp.where(j_idx == i, LARGE_NUMBER, r_ref[...]), u_i)
        r_ref[...] = r_new
        rm = jnp.where(j_idx <= i, r_new, NEG_LARGE)             # [T, L]

        if scale > 0:
            # Softmin over the pair {v, rm}: weight on rm is sigmoid((v-rm)*scale).
            # Stable single-exp sigmoid (exponentiates only non-positive values).
            d = (v - rm) * scale
            et = jnp.exp(-jnp.abs(d))
            w_rm = jnp.where(d >= 0, 1.0 / (1.0 + et), et / (1.0 + et))
            z = v + (rm - v) * w_rm                              # [T, L]
            # Soft max over j (sublane axis), stabilized.
            m = jnp.max(z, axis=0, keepdims=True)
            e = jnp.exp((z - m) * scale)
            out = jnp.sum(e * z, axis=0, keepdims=True) / jnp.sum(e, axis=0, keepdims=True)
        else:
            z = jnp.minimum(v, rm)
            out = jnp.max(z, axis=0, keepdims=True)              # [1, L]

        o_ref[pl.ds(i, 1), :] = out.astype(o_ref.dtype)


def stl_until_forward(trace1, trace2, scale=0):
    """Pallas equivalent of Until().forward(trace1, trace2, scale).

    trace1, trace2: [batch, time, x_dim] float arrays.
    `scale` must be a static Python number (as in PyTorch, where it gates a
    Python-level `if scale > 0`).
    Returns: [batch, time, x_dim].
    """
    assert trace1.shape == trace2.shape
    assert trace1.dtype == trace2.dtype
    B, T, X = trace1.shape
    dtype = trace1.dtype

    # Lane-dense layout: fold (batch, x_dim) into lanes, time on sublanes.
    def to_tl(x):
        return jnp.transpose(x, (1, 0, 2)).reshape(T, B * X)

    t1 = to_tl(trace1)
    t2 = to_tl(trace2)

    N = B * X
    n_pad = ((N + 127) // 128) * 128
    if n_pad != N:
        pad = [(0, 0), (0, n_pad - N)]
        t1 = jnp.pad(t1, pad)
        t2 = jnp.pad(t2, pad)

    # Widest lane tile (multiple of 128) that divides the padded width while
    # keeping ~7 live tiles (2 inputs + 1 output double-buffered + scratch)
    # under ~8 MiB -> safe for v5e's 16 MiB default scoped VMEM limit.
    lane_tile = 128
    for cand in (1024, 512, 256):
        if n_pad % cand == 0 and 7 * T * cand * 4 <= 8 * 1024 * 1024:
            lane_tile = cand
            break
    grid = (n_pad // lane_tile,)

    kernel = functools.partial(_until_kernel, scale=float(scale))
    spec = pl.BlockSpec((T, lane_tile), lambda l: (0, l))

    out = pl.pallas_call(
        kernel,
        out_shape=jax.ShapeDtypeStruct((T, n_pad), dtype),
        grid=grid,
        in_specs=[spec, spec],
        out_specs=spec,
        scratch_shapes=[pltpu.VMEM((T, lane_tile), jnp.float32)],
        compiler_params=pltpu.CompilerParams(
            dimension_semantics=("parallel",)),
    )(t1, t2)

    out = out[:, :N].reshape(T, B, X)
    return jnp.transpose(out, (1, 0, 2))


def _until_reference(trace1, trace2, scale=0):
    """Pure-JAX transcription of the PyTorch Until.robustness_trace."""
    B, T, X = trace2.shape
    # RHS[b, i, x, j] = min(1e4, cummin_{s=j..i} trace1)  (j <= i), else -1e6
    cols = []
    for j in range(T):
        cm = jnp.minimum(lax.cummin(trace1[:, j:, :], axis=1), LARGE_NUMBER)
        col = jnp.concatenate(
            [jnp.full((B, j, X), NEG_LARGE, trace1.dtype), cm], axis=1)
        cols.append(col)
    RHS = jnp.stack(cols, axis=-1)                               # [B, T, X, T]
    LHS = jnp.broadcast_to(
        jnp.transpose(trace2, (0, 2, 1))[:, None, :, :], (B, T, X, T))
    xx = jnp.stack([LHS, RHS], axis=-1)                          # [B, T, X, T, 2]
    if scale > 0:
        z = jnp.sum(jax.nn.softmax(-xx * scale, axis=-1) * xx, axis=-1)
        return jnp.sum(jax.nn.softmax(z * scale, axis=-1) * z, axis=-1)
    z = jnp.min(xx, axis=-1)
    return jnp.max(z, axis=-1)


if __name__ == "__main__":
    key = jax.random.PRNGKey(0)
    k1, k2 = jax.random.split(key)
    B, T, X = 2, 8, 32  # [batch_size, time_dim, x_dim]
    trace1 = jax.random.normal(k1, (B, T, X), dtype=jnp.float32)
    trace2 = jax.random.normal(k2, (B, T, X), dtype=jnp.float32)

    # Default path (scale=0): hard min / hard max.
    out_hard = stl_until_forward(trace1, trace2, scale=0)
    jax.block_until_ready(out_hard)
    ref_hard = _until_reference(trace1, trace2, scale=0)
    assert out_hard.shape == (B, T, X)
    assert jnp.allclose(out_hard, ref_hard, atol=1e-6), "hard Until mismatch"

    # Soft path (scale > 0): softmin pair + softmax over time.
    out_soft = stl_until_forward(trace1, trace2, scale=5.0)
    jax.block_until_ready(out_soft)
    ref_soft = _until_reference(trace1, trace2, scale=5.0)
    assert jnp.allclose(out_soft, ref_soft, atol=1e-5, rtol=1e-5), "soft Until mismatch"

    print("KERNEL_OK")
</pallas_src>

<mosaic_0001>
module attributes {stable_mosaic.version = 11 : i64} {
  func.func @_until_kernel(%arg0: i32, %arg1: memref<8x128xf32, #tpu.memory_space<vmem>>, %arg2: memref<8x128xf32, #tpu.memory_space<vmem>>, %arg3: memref<8x128xf32, #tpu.memory_space<vmem>>, %arg4: memref<8x128xf32, #tpu.memory_space<vmem>>) attributes {dimension_semantics = [#tpu.dimension_semantics<parallel>], iteration_bounds = array<i64: 1>, scalar_prefetch = 0 : i64, scratch_operands = 1 : i64, tpu.core_type = #tpu.core_type<tc>, window_params = [{transform_indices = @transform_0, window_bounds = array<i64: 8, 128>}, {transform_indices = @transform_1, window_bounds = array<i64: 8, 128>}, {transform_indices = @transform_2, window_bounds = array<i64: 8, 128>}]} {
    %c0 = arith.constant 0 : index
    %c0_0 = arith.constant 0 : index
    %0 = vector.load %arg2[%c0, %c0_0] : memref<8x128xf32, #tpu.memory_space<vmem>>, vector<8x128xf32>
    %1 = tpu.iota {dimensions = array<i32: 0>} : vector<8x128xi32>
    %cst = arith.constant 1.000000e+04 : f32
    %2 = vector.broadcast %cst : f32 to vector<8x128xf32>
    %c0_1 = arith.constant 0 : index
    %c0_2 = arith.constant 0 : index
    %3 = vector.load %arg4[%c0_1, %c0_2] : memref<8x128xf32, #tpu.memory_space<vmem>>, vector<8x128xf32>
    tpu.vector_store %arg4[%c0_1, %c0_2], %2 {strides = array<i32>} : memref<8x128xf32, #tpu.memory_space<vmem>>, vector<8x128xf32>,
    %c0_i32 = arith.constant 0 : i32
    %c8_i32 = arith.constant 8 : i32
    %4 = arith.addi %c0_i32, %c8_i32 : i32
    %c1_i32 = arith.constant 1 : i32
    scf.for %arg5 = %c0_i32 to %4 step %c1_i32  : i32 {
      %c1_i32_4 = arith.constant 1 : i32
      %5 = arith.muli %arg5, %c1_i32_4 : i32
      %c0_i32_5 = arith.constant 0 : i32
      %6 = arith.addi %c0_i32_5, %5 : i32
      %7 = arith.index_cast %6 : i32 to index
      %c0_6 = arith.constant 0 : index
      %8 = vector.load %arg1[%7, %c0_6] : memref<8x128xf32, #tpu.memory_space<vmem>>, vector<1x128xf32>
      %9 = vector.broadcast %6 : i32 to vector<8x128xi32>
      %10 = arith.cmpi eq, %1, %9 : vector<8x128xi32>
      %c0_7 = arith.constant 0 : index
      %c0_8 = arith.constant 0 : index
      %11 = vector.load %arg4[%c0_7, %c0_8] : memref<8x128xf32, #tpu.memory_space<vmem>>, vector<8x128xf32>
      %cst_9 = arith.constant 1.000000e+04 : f32
      %12 = vector.broadcast %cst_9 : f32 to vector<8x128xf32>
      %13 = arith.select %10, %12, %11 : vector<8x128xi1>, vector<8x128xf32>
      %14 = vector.broadcast %8 : vector<1x128xf32> to vector<8x128xf32>
      %15 = arith.minimumf %13, %14 : vector<8x128xf32>
      %c0_10 = arith.constant 0 : index
      %c0_11 = arith.constant 0 : index
      %16 = vector.load %arg4[%c0_10, %c0_11] : memref<8x128xf32, #tpu.memory_space<vmem>>, vector<8x128xf32>
      tpu.vector_store %arg4[%c0_10, %c0_11], %15 {strides = array<i32>} : memref<8x128xf32, #tpu.memory_space<vmem>>, vector<8x128xf32>,
      %17 = vector.broadcast %6 : i32 to vector<8x128xi32>
      %18 = arith.cmpi sle, %1, %17 : vector<8x128xi32>
      %cst_12 = arith.constant -1.000000e+06 : f32
      %19 = vector.broadcast %cst_12 : f32 to vector<8x128xf32>
      %20 = arith.select %18, %15, %19 : vector<8x128xi1>, vector<8x128xf32>
      %21 = arith.minimumf %0, %20 : vector<8x128xf32>
      %cst_13 = arith.constant dense<0xFF800000> : vector<128xf32>
      %22 = vector.multi_reduction <maximumf>, %21, %cst_13 [0] : vector<8x128xf32> to vector<128xf32>
      %23 = vector.shape_cast %22 : vector<128xf32> to vector<1x128xf32>
      %24 = arith.index_cast %6 : i32 to index
      %c0_14 = arith.constant 0 : index
      %25 = vector.load %arg3[%24, %c0_14] : memref<8x128xf32, #tpu.memory_space<vmem>>, vector<1x128xf32>
      tpu.vector_store %arg3[%24, %c0_14], %23 {strides = array<i32>} : memref<8x128xf32, #tpu.memory_space<vmem>>, vector<1x128xf32>,
    }
    %c8_i32_3 = arith.constant 8 : i32
    return
  }
  func.func @transform_0(%arg0: i32) -> (i32, i32) {
    %c0_i32 = arith.constant 0 : i32
    %c0_i32_0 = arith.constant 0 : i32
    return %c0_i32, %arg0 : i32, i32
  }
  func.func @transform_1(%arg0: i32) -> (i32, i32) {
    %c0_i32 = arith.constant 0 : i32
    %c0_i32_0 = arith.constant 0 : i32
    return %c0_i32, %arg0 : i32, i32
  }
  func.func @transform_2(%arg0: i32) -> (i32, i32) {
    %c0_i32 = arith.constant 0 : i32
    %c0_i32_0 = arith.constant 0 : i32
    return %c0_i32, %arg0 : i32, i32
  }
}

</mosaic_0001>

<bundles_post_ra>
// kernel: tpu_custom_call.1
= control target key start
LH: loop header
LB: loop body
LE: loop exit
PB: predicated region body
PF: predicated region fallthrough
CT: control target
= control target key end

     0   :  { %7 = vsyncpa [#allocation4], 0  ;;  %s240_s0 = inlined_call_operand.hbm [shape: f32[8,128], index: 0, kind: input, shape index: {}]   ;;  %s241_s1 = inlined_call_operand.hbm [shape: f32[8,128], index: 1, kind: input, shape index: {}]   ;;  %s242_s2 = inlined_call_operand.hbm [shape: f32[8,128], index: 2, kind: output, shape index: {}]  }
   0x1   :  { %8 = vsyncpa [#allocation7], 0 }
   0x2   :  { %9 = vsyncpa [#allocation5], 0  ;;  %s185_s9 = smov [#allocation3]   ;;  %s186_s11 = smov [#allocation6]  }
   0x3   :  { %s16_s10 = sshll.u32 %s185_s9, 4  ;;  %s26_s12 = sshll.u32 %s186_s11, 4  ;;  %s17_s10 = int_to_ptr.vmem [resolvable:$true] %s16_s10  ;;  %s27_s12 = int_to_ptr.vmem [resolvable:$true] %s26_s12 }
   0x4   :  { %s105_s15 = scalar_lea.hbm %s240_s0, 128 }
   0x5   :  { %p106_p0 = scmp.ne.s32.totalorder %s240_s0, %s105_s15  ;;  %p109_p1 = scmp.lt.u32.totalorder %s105_s15, %s240_s0 }
   0x7   :  { %p111_p2 = pnand %p109_p1, %p106_p0 }
   0x9   :  { %114 = shalt.err (!%p111_p2)
}
   0xa   :  { %s115_s20 = scalar_lea.vmem %s17_s10, 128  ;;  %p120_p4 = scmp.lt.s32.totalorder %s17_s10, %s17_s10 }
   0xb   :  { %p116_p3 = scmp.ne.s32.totalorder %s17_s10, %s115_s20  ;;  %p121_p5 = scmp.lt.s32.totalorder %s115_s20, %s115_s20 }
   0xd   :  { %p122_p6 = por %p121_p5, %p120_p4 }
   0xf   :  { %p123_p7 = pnand %p122_p6, %p116_p3 }
  0x11   :  { %126 = shalt.err (!%p123_p7)
}
  0x12   :  { %19 = dma.hbm_to_vmem [thread:$0]  %s240_s0, 128, %s17_s10, [#allocation4]  }
  0x13   :  { %s127_s25 = scalar_lea.hbm %s241_s1, 128 }
  0x14   :  { %p128_p8 = scmp.ne.s32.totalorder %s241_s1, %s127_s25  ;;  %p131_p9 = scmp.lt.u32.totalorder %s127_s25, %s241_s1 }
  0x16   :  { %p133_p10 = pnand %p131_p9, %p128_p8 }
  0x18   :  { %136 = shalt.err (!%p133_p10)
}
  0x19   :  { %s137_s30 = scalar_lea.vmem %s27_s12, 128  ;;  %p142_p12 = scmp.lt.s32.totalorder %s27_s12, %s27_s12 }
  0x1a   :  { %p138_p11 = scmp.ne.s32.totalorder %s27_s12, %s137_s30  ;;  %p143_p13 = scmp.lt.s32.totalorder %s137_s30, %s137_s30 }
  0x1c   :  { %p144_p0 = por %p143_p13, %p142_p12 }
  0x1e   :  { %p145_p1 = pnand %p144_p0, %p138_p11 }
  0x20   :  { %148 = shalt.err (!%p145_p1)
}
  0x21   :  { %29 = dma.hbm_to_vmem [thread:$0]  %s241_s1, 128, %s27_s12, [#allocation7]  }
  0x22   :  { %175 = dma.done.wait [#allocation4], 128  }
  0x23   :  { %176 = vsyncadd [#allocation4], 4294967168 }
  0x24   :  { %177 = dma.done.wait [#allocation7], 128  }
  0x25   :  { %178 = vsyncadd [#allocation7], 4294967168  ;;  %v37_v0 = vlaneseq  ;;  %v187_v1 = vmov 10000.0   ;;  %v36_v3 = vld [vmem:[#allocation6] sm:$0xff]  ;;  %s181_s4 = smov 0  }
  0x26   :  { %39 = vst [vmem:[#allocation2] sm:$0xff] %v187_v1 }
  0x27   :  { %v38_v2 = vshrl.u32 %v37_v0, 7 }
  0x28 LB: > { %v48_v5 = vstv %s183_s4  ;;  %s46_s5 = scalar_lea.vmem [#allocation3], %s183_s4  ;;  %s67_s1 = scalar_lea.vmem [#allocation8], %s183_s4  ;;  %s183_s4 = sphi %s181_s4, %s45_s4  }
  0x29   : > { %v92_v6 = vld [vmem:[%s46_s5] ss:$0 sm:$0xff]  ;;  %vm49_vm0 = vcmp.eq.s32.totalorder %v38_v2, %v48_v5  ;;  %vm58_vm1 = vcmp.le.s32.totalorder %v38_v2, %v48_v5  ;;  %s45_s4 = sadd.s32 1, %s183_s4  }
  0x2a   : > { %p42_p2 = scmp.ge.s32.totalorder %s45_s4, 8  }
  0x2b   :  { %s188_s6 = smov (%p42_p2), [#allocation8]  }
  0x2c   :  { %s75_s7 = sshll.u32 (%p42_p2), %s188_s6, 4  ;;  %s76_s7 = int_to_ptr.vmem [resolvable:$true] %s75_s7 }
  0x2d   : > { %v50_v4 = vld [vmem:[#allocation2] sm:$0xff]  ;;  %s149_s8 = scalar_lea.vmem (%p42_p2), %s76_s7, 128  ;;  %p154_p4 = scmp.lt.s32.totalorder (%p42_p2), %s76_s7, %s76_s7 }
  0x2e   : > { %v51_v7 = vsel %vm49_vm0, 10000.0, %v50_v4  ;;  %p150_p3 = scmp.ne.s32.totalorder (%p42_p2), %s76_s7, %s149_s8  ;;  %p155_p5 = scmp.lt.s32.totalorder (%p42_p2), %s149_s8, %s149_s8 }
  0x2f   : > { %v56_v8 = vmin.f32 %v51_v7, %v92_v6 }
  0x30   :  { %p156_p6 = por (%p42_p2), %p155_p5, %p154_p4 }
  0x31   : > { %57 = vst [vmem:[#allocation2] sm:$0xff] %v56_v8  ;;  %v59_v9 = vsel %vm58_vm1, %v56_v8, -1000000.0 }
  0x32   : > { %v60_v10 = vmin.f32 %v36_v3, %v59_v9  ;;  %p157_p7 = pnand (%p42_p2), %p156_p6, %p150_p3 }
  0x34   : > { %v61_v11 = vrot.slane %v60_v10, 4 }
  0x36   : > { %v62_v12 = vmax.f32 %v60_v10, %v61_v11 }
  0x38   : > { %v63_v13 = vrot.slane %v62_v12, 2 }
  0x3a   : > { %v64_v14 = vmax.f32 %v62_v12, %v63_v13  ;;  %44 = sbr.rel (!%p42_p2) target bundleno = 40 (0x28), region = 45 }
  0x3c   : > { %v65_v15 = vrot.slane %v64_v14, 1 }
  0x3e   : > { %v66_v16 = vmax.f32 %v64_v14, %v65_v15 }
  0x40   : > { %68 = vst [vmem:[%s67_s1] sm:$0x1] %v66_v16 }
  0x41   :  { %160 = shalt.err (!%p157_p7)
}
  0x42   :  { %s161_s11 = scalar_lea.hbm %s242_s2, 128 }
  0x43   :  { %p162_p8 = scmp.ne.s32.totalorder %s242_s2, %s161_s11  ;;  %p165_p9 = scmp.lt.u32.totalorder %s161_s11, %s242_s2 }
  0x45   :  { %p167_p10 = pnand %p165_p9, %p162_p8 }
  0x47   :  { %170 = shalt.err (!%p167_p10)
}
  0x48   :  { %78 = dma.vmem_to_hbm [thread:$0]  %s76_s7, 128, %s242_s2, [#allocation5]  }
  0x49   :  { %179 = dma.done.wait [#allocation5], 128  }
  0x4a   :  { %180 = vsyncadd [#allocation5], 4294967168 }
  0x4b   :  { %82 = vsyncpa [#allocation4], 1 }
  0x4c   :  { %83 = vsyncpa [#allocation7], 1 }
  0x4d   :  { %84 = vsyncpa [#allocation5], 1 }

</bundles_post_ra>
